<compile_context>
chip_gen: v5e
topology: v5e:2x2
jax: 0.10.0
libtpu: 0.0.40
codegen_flags: <defaults>
</compile_context>

<pallas_src>
import jax
import jax.numpy as jnp
from jax.experimental import pallas as pl
from jax.experimental.pallas import tpu as pltpu


def _round_up(n, m):
    return ((n + m - 1) // m) * m


def _mlp_kernel(x_ref, w1_ref, b1_ref, w2_ref, b2_ref, w3_ref, b3_ref, o_ref):
    # Layer 1 (MXU, bf16 inputs / f32 accumulate): (TB, F) @ (F, 512)
    h1 = jnp.dot(x_ref[...], w1_ref[...], preferred_element_type=jnp.float32)
    h1 = jnp.maximum(h1 + b1_ref[...], 0.0)          # bias + ReLU in f32 (VPU)
    # Dropout(0.2): identity in eval/inference mode.

    # Layer 2 (MXU): (TB, 512) @ (512, 256)
    h2 = jnp.dot(h1.astype(w2_ref.dtype), w2_ref[...],
                 preferred_element_type=jnp.float32)
    h2 = jnp.maximum(h2 + b2_ref[...], 0.0)
    # Dropout(0.2): identity in eval/inference mode.

    # Layer 3: 256 -> 1.  Contract h2's feature axis against the (1, 256)
    # weight row (a @ b^T) so the result comes out directly as a lane-dense
    # (1, TB) row -- no in-kernel relayout, no lane-width-1 masked stores.
    z = jax.lax.dot_general(
        w3_ref[...], h2.astype(w3_ref.dtype),
        dimension_numbers=(((1,), (1,)), ((), ())),
        preferred_element_type=jnp.float32) + b3_ref[...]        # (1, TB)

    # Sigmoid via tanh -> EUP bundle slot (no explicit VALU divide).
    o_ref[...] = (0.5 * (jnp.tanh(0.5 * z) + 1.0)).astype(o_ref.dtype)


def neural_net_1_forward(x, params, *, block_b=512,
                         compute_dtype=jnp.bfloat16):
    """Pallas forward pass.

    x: (B, features) or (B, S, features) float32.
    Returns (B, 1, 1) for 2-D input (mirrors torch's unsqueeze(1)),
    (B, S, 1) for 3-D input.
    """
    if x.ndim == 2:
        lead = (x.shape[0], 1)
        x2 = x
    else:
        lead = x.shape[:-1]
        x2 = x.reshape(-1, x.shape[-1])
    B, F = x2.shape

    w1, b1, w2, b2, w3, b3 = params

    # MXU inputs in compute_dtype (bf16 by default); bias math stays f32.
    x_c = x2.astype(compute_dtype)
    w1_c = w1.astype(compute_dtype)
    w2_c = w2.astype(compute_dtype)
    w3_row = w3.reshape(1, -1).astype(compute_dtype)      # (1, 256)
    b1r = b1.reshape(1, -1).astype(jnp.float32)           # (1, 512)
    b2r = b2.reshape(1, -1).astype(jnp.float32)           # (1, 256)
    b3r = b3.reshape(1, 1).astype(jnp.float32)            # (1, 1)

    # Batch tiling (sublane axis of x, lane axis of the output): tile must be a
    # multiple of 8; pad ragged B with zeros (padded rows are sliced off below).
    tb = min(block_b, _round_up(B, 8))
    b_pad = _round_up(B, tb)
    if b_pad != B:
        x_c = jnp.pad(x_c, ((0, b_pad - B), (0, 0)))
    grid = (pl.cdiv(b_pad, tb),)

    # Weights/biases: full-array blocks with constant index maps -> DMA'd once,
    # VMEM-resident across all grid steps.
    resident = lambda a: pl.BlockSpec(a.shape, lambda i: (0,) * a.ndim)

    out_row = pl.pallas_call(
        _mlp_kernel,
        out_shape=jax.ShapeDtypeStruct((1, b_pad), jnp.float32),
        grid=grid,
        in_specs=[
            pl.BlockSpec((tb, F), lambda i: (i, 0)),       # x tile (pipelined)
            resident(w1_c), resident(b1r),
            resident(w2_c), resident(b2r),
            resident(w3_row), resident(b3r),
        ],
        # Lane-dense output row: batch on lanes -> unmasked full-width stores
        # whenever TB is a multiple of 128 (default TB=512).
        out_specs=pl.BlockSpec((1, tb), lambda i: (0, i)),
        compiler_params=pltpu.CompilerParams(
            # Independent batch tiles -> shard across v7x's 2 TensorCores.
            dimension_semantics=("parallel",),
        ),
    )(x_c, w1_c, b1r, w2_c, b2r, w3_row, b3r)

    out = out_row[0, :B]                  # drop zero-padded (garbage) rows
    return out.reshape(*lead, 1)


def neural_net_1_reference(x, params):
    """Pure-JAX (XLA) reference, matching the PyTorch module in f32."""
    w1, b1, w2, b2, w3, b3 = params
    if x.ndim == 2:
        x = x[:, None, :]
    h = jnp.maximum(x @ w1 + b1, 0.0)
    h = jnp.maximum(h @ w2 + b2, 0.0)
    return jax.nn.sigmoid(h @ w3 + b3)


def neural_net_1(x, params, *, block_b=512, min_pallas_batch=512):
    """Dispatcher: tiny batches go to plain XLA (pallas_call launch + DMA setup
    dominates and the MXU is <1% utilized); large batches use the kernel."""
    batch_rows = x.shape[0] if x.ndim == 2 else x.shape[0] * x.shape[1]
    if batch_rows < min_pallas_batch:
        return neural_net_1_reference(x, params)
    return neural_net_1_forward(x, params, block_b=block_b)


def init_params(key, features):
    """Deterministic init matching PyTorch Linear shapes (stored as (in, out))."""
    ks = jax.random.split(key, 6)

    def linear(kw, kb, fan_in, fan_out):
        bound = 1.0 / jnp.sqrt(fan_in)
        w = jax.random.uniform(kw, (fan_in, fan_out), jnp.float32, -bound, bound)
        b = jax.random.uniform(kb, (fan_out,), jnp.float32, -bound, bound)
        return w, b

    w1, b1 = linear(ks[0], ks[1], features, 512)
    w2, b2 = linear(ks[2], ks[3], 512, 256)
    w3, b3 = linear(ks[4], ks[5], 256, 1)
    return (w1, b1, w2, b2, w3, b3)


if __name__ == "__main__":
    key = jax.random.PRNGKey(0)
    k_x, k_p = jax.random.split(key)

    features = 32
    batch = 8
    x = jax.random.normal(k_x, (batch, features), jnp.float32)
    params = init_params(k_p, features)

    # Exercise the Pallas path directly (production code would go through
    # neural_net_1(), which routes tiny batches to plain XLA).
    y = neural_net_1_forward(x, params)
    jax.block_until_ready(y)
    assert y.shape == (batch, 1, 1), y.shape

    y_ref = neural_net_1_reference(x, params)
    max_err = float(jnp.max(jnp.abs(y - y_ref)))
    assert bool(jnp.all((y >= 0.0) & (y <= 1.0)))
    assert max_err < 2e-2, f"max |pallas - ref| = {max_err}"   # bf16 vs f32 ref

    print("KERNEL_OK")
</pallas_src>

<mosaic_0001>
module attributes {stable_mosaic.version = 11 : i64} {
  func.func @_mlp_kernel(%arg0: i32, %arg1: memref<8x32xbf16, #tpu.memory_space<vmem>>, %arg2: memref<32x512xbf16, #tpu.memory_space<vmem>>, %arg3: memref<1x512xf32, #tpu.memory_space<vmem>>, %arg4: memref<512x256xbf16, #tpu.memory_space<vmem>>, %arg5: memref<1x256xf32, #tpu.memory_space<vmem>>, %arg6: memref<1x256xbf16, #tpu.memory_space<vmem>>, %arg7: memref<1x1xf32, #tpu.memory_space<vmem>>, %arg8: memref<1x8xf32, #tpu.memory_space<vmem>>) attributes {dimension_semantics = [#tpu.dimension_semantics<parallel>], iteration_bounds = array<i64: 1>, scalar_prefetch = 0 : i64, scratch_operands = 0 : i64, tpu.core_type = #tpu.core_type<tc>, window_params = [{transform_indices = @transform_0, window_bounds = array<i64: 8, 32>}, {pipeline_mode = #tpu.pipeline_mode<synchronous>, transform_indices = @transform_1, window_bounds = array<i64: 32, 512>}, {pipeline_mode = #tpu.pipeline_mode<synchronous>, transform_indices = @transform_2, window_bounds = array<i64: 1, 512>}, {pipeline_mode = #tpu.pipeline_mode<synchronous>, transform_indices = @transform_3, window_bounds = array<i64: 512, 256>}, {pipeline_mode = #tpu.pipeline_mode<synchronous>, transform_indices = @transform_4, window_bounds = array<i64: 1, 256>}, {pipeline_mode = #tpu.pipeline_mode<synchronous>, transform_indices = @transform_5, window_bounds = array<i64: 1, 256>}, {pipeline_mode = #tpu.pipeline_mode<synchronous>, transform_indices = @transform_6, window_bounds = array<i64: 1, 1>}, {transform_indices = @transform_7, window_bounds = array<i64: 1, 8>}]} {
    %c0 = arith.constant 0 : index
    %c0_0 = arith.constant 0 : index
    %0 = vector.load %arg1[%c0, %c0_0] : memref<8x32xbf16, #tpu.memory_space<vmem>>, vector<8x32xbf16>
    %c0_1 = arith.constant 0 : index
    %c0_2 = arith.constant 0 : index
    %1 = vector.load %arg2[%c0_1, %c0_2] : memref<32x512xbf16, #tpu.memory_space<vmem>>, vector<32x512xbf16>
    %cst = arith.constant dense<0.000000e+00> : vector<8x512xf32>
    %2 = tpu.matmul %0, %1, %cst {dimension_numbers = #tpu.dot_dimension_numbers<[1], [0], [0], [1], [0, 0, 1, 1], [], []>} : vector<8x32xbf16>, vector<32x512xbf16>, vector<8x512xf32> -> vector<8x512xf32>
    %c0_3 = arith.constant 0 : index
    %c0_4 = arith.constant 0 : index
    %3 = vector.load %arg3[%c0_3, %c0_4] : memref<1x512xf32, #tpu.memory_space<vmem>>, vector<1x512xf32>
    %4 = vector.broadcast %3 : vector<1x512xf32> to vector<8x512xf32>
    %5 = arith.addf %2, %4 : vector<8x512xf32>
    %cst_5 = arith.constant 0.000000e+00 : f32
    %6 = vector.broadcast %cst_5 : f32 to vector<8x512xf32>
    %7 = arith.maximumf %5, %6 : vector<8x512xf32>
    %8 = arith.truncf %7 : vector<8x512xf32> to vector<8x512xbf16>
    %c0_6 = arith.constant 0 : index
    %c0_7 = arith.constant 0 : index
    %9 = vector.load %arg4[%c0_6, %c0_7] : memref<512x256xbf16, #tpu.memory_space<vmem>>, vector<512x256xbf16>
    %cst_8 = arith.constant dense<0.000000e+00> : vector<8x256xf32>
    %10 = tpu.matmul %8, %9, %cst_8 {dimension_numbers = #tpu.dot_dimension_numbers<[1], [0], [0], [1], [0, 0, 1, 1], [], []>} : vector<8x512xbf16>, vector<512x256xbf16>, vector<8x256xf32> -> vector<8x256xf32>
    %c0_9 = arith.constant 0 : index
    %c0_10 = arith.constant 0 : index
    %11 = vector.load %arg5[%c0_9, %c0_10] : memref<1x256xf32, #tpu.memory_space<vmem>>, vector<1x256xf32>
    %12 = vector.broadcast %11 : vector<1x256xf32> to vector<8x256xf32>
    %13 = arith.addf %10, %12 : vector<8x256xf32>
    %cst_11 = arith.constant 0.000000e+00 : f32
    %14 = vector.broadcast %cst_11 : f32 to vector<8x256xf32>
    %15 = arith.maximumf %13, %14 : vector<8x256xf32>
    %c0_12 = arith.constant 0 : index
    %c0_13 = arith.constant 0 : index
    %16 = vector.load %arg6[%c0_12, %c0_13] : memref<1x256xbf16, #tpu.memory_space<vmem>>, vector<1x256xbf16>
    %17 = arith.truncf %15 : vector<8x256xf32> to vector<8x256xbf16>
    %cst_14 = arith.constant dense<0.000000e+00> : vector<1x8xf32>
    %18 = tpu.matmul %16, %17, %cst_14 {dimension_numbers = #tpu.dot_dimension_numbers<[1], [1], [0], [0], [0, 0, 1, 0], [], []>} : vector<1x256xbf16>, vector<8x256xbf16>, vector<1x8xf32> -> vector<1x8xf32>
    %c0_15 = arith.constant 0 : index
    %c0_16 = arith.constant 0 : index
    %19 = vector.load %arg7[%c0_15, %c0_16] : memref<1x1xf32, #tpu.memory_space<vmem>>, vector<1x1xf32>
    %20 = vector.broadcast %19 : vector<1x1xf32> to vector<1x8xf32>
    %21 = arith.addf %18, %20 : vector<1x8xf32>
    %cst_17 = arith.constant 5.000000e-01 : f32
    %22 = vector.broadcast %cst_17 : f32 to vector<1x8xf32>
    %23 = arith.mulf %22, %21 : vector<1x8xf32>
    %24 = math.tanh %23 : vector<1x8xf32>
    %cst_18 = arith.constant 1.000000e+00 : f32
    %25 = vector.broadcast %cst_18 : f32 to vector<1x8xf32>
    %26 = arith.addf %24, %25 : vector<1x8xf32>
    %cst_19 = arith.constant 5.000000e-01 : f32
    %27 = vector.broadcast %cst_19 : f32 to vector<1x8xf32>
    %28 = arith.mulf %27, %26 : vector<1x8xf32>
    %c0_20 = arith.constant 0 : index
    %c0_21 = arith.constant 0 : index
    %29 = vector.load %arg8[%c0_20, %c0_21] : memref<1x8xf32, #tpu.memory_space<vmem>>, vector<1x8xf32>
    tpu.vector_store %arg8[%c0_20, %c0_21], %28 {strides = array<i32>} : memref<1x8xf32, #tpu.memory_space<vmem>>, vector<1x8xf32>,
    return
  }
  func.func @transform_0(%arg0: i32) -> (i32, i32) {
    %c0_i32 = arith.constant 0 : i32
    %c0_i32_0 = arith.constant 0 : i32
    return %arg0, %c0_i32 : i32, i32
  }
  func.func @transform_1(%arg0: i32) -> (i32, i32) {
    %c0_i32 = arith.constant 0 : i32
    %c0_i32_0 = arith.constant 0 : i32
    %c0_i32_1 = arith.constant 0 : i32
    return %c0_i32, %c0_i32_0 : i32, i32
  }
  func.func @transform_2(%arg0: i32) -> (i32, i32) {
    %c0_i32 = arith.constant 0 : i32
    %c0_i32_0 = arith.constant 0 : i32
    %c0_i32_1 = arith.constant 0 : i32
    return %c0_i32, %c0_i32_0 : i32, i32
  }
  func.func @transform_3(%arg0: i32) -> (i32, i32) {
    %c0_i32 = arith.constant 0 : i32
    %c0_i32_0 = arith.constant 0 : i32
    %c0_i32_1 = arith.constant 0 : i32
    return %c0_i32, %c0_i32_0 : i32, i32
  }
  func.func @transform_4(%arg0: i32) -> (i32, i32) {
    %c0_i32 = arith.constant 0 : i32
    %c0_i32_0 = arith.constant 0 : i32
    %c0_i32_1 = arith.constant 0 : i32
    return %c0_i32, %c0_i32_0 : i32, i32
  }
  func.func @transform_5(%arg0: i32) -> (i32, i32) {
    %c0_i32 = arith.constant 0 : i32
    %c0_i32_0 = arith.constant 0 : i32
    %c0_i32_1 = arith.constant 0 : i32
    return %c0_i32, %c0_i32_0 : i32, i32
  }
  func.func @transform_6(%arg0: i32) -> (i32, i32) {
    %c0_i32 = arith.constant 0 : i32
    %c0_i32_0 = arith.constant 0 : i32
    %c0_i32_1 = arith.constant 0 : i32
    return %c0_i32, %c0_i32_0 : i32, i32
  }
  func.func @transform_7(%arg0: i32) -> (i32, i32) {
    %c0_i32 = arith.constant 0 : i32
    %c0_i32_0 = arith.constant 0 : i32
    return %c0_i32, %arg0 : i32, i32
  }
}

</mosaic_0001>

<bundles_post_ra>
// kernel: tpu_custom_call.1
= control target key start
LH: loop header
LB: loop body
LE: loop exit
PB: predicated region body
PF: predicated region fallthrough
CT: control target
= control target key end

     0   :  { %s1358_s0 = inlined_call_operand.hbm [shape: bf16[8,32], index: 0, kind: input, shape index: {}]   ;;  %s1359_s1 = inlined_call_operand.hbm [shape: bf16[32,512], index: 1, kind: input, shape index: {}]   ;;  %s1360_s2 = inlined_call_operand.hbm [shape: f32[1,512], index: 2, kind: input, shape index: {}]   ;;  %s1361_s3 = inlined_call_operand.hbm [shape: bf16[512,256], index: 3, kind: input, shape index: {}]   ;;  %s1362_s4 = inlined_call_operand.vmem [shape: f32[1,256], index: 4, kind: input, shape index: {}]   ;;  %s1363_s5 = inlined_call_operand.vmem [shape: bf16[1,256], index: 5, kind: input, shape index: {}]   ;;  %s1364_s6 = inlined_call_operand.<no memory space> [shape: f32[1,1], index: 6, kind: input, shape index: {}]   ;;  %s1365_s7 = inlined_call_operand.hbm [shape: f32[1,8], index: 7, kind: output, shape index: {}]  }
   0x1   :  { %v12_v0 = vstv %s1364_s6 }
   0x2   :  { %13 = vst [vmem:[#allocation2] sm:$0x1] %v12_v0 }
   0x3   :  { %14 = vsyncpa [#allocation4], 0 }
   0x4   :  { %15 = vsyncpa [#allocation7], 0 }
   0x5   :  { %16 = vsyncpa [#allocation10], 0  ;;  %s33_s28 = sshll.u32 %s1359_s1, 4  ;;  %s34_s28 = int_to_ptr.hbm [resolvable:$true] %s33_s28 }
   0x6   :  { %17 = vsyncpa [#allocation5], 0  ;;  %s1280_s29 = smov [#allocation6]   ;;  %s23_s10 = sshll.u32 %s1358_s0, 4  ;;  %s24_s10 = int_to_ptr.hbm [resolvable:$true] %s23_s10 }
   0x7   :  { %s35_s30 = sshll.u32 %s1280_s29, 4  ;;  %s1281_s11 = smov 256   ;;  %s36_s30 = int_to_ptr.vmem [resolvable:$true] %s35_s30 }
   0x8   :  { %s1282_s12 = smov 16   ;;  %s1283_s6 = smov [#allocation3]  }
   0x9   :  { %41 = dma.hbm_to_vmem [thread:$0]  %s34_s28, 1024, %s36_s30, [#allocation7], %s1281_s11, %s1281_s11, %s1282_s12  }
   0xa   :  { %s25_s13 = sshll.u32 %s1283_s6, 4  ;;  %s47_s16 = sshll.u32 %s1360_s2, 4  ;;  %s26_s13 = int_to_ptr.vmem [resolvable:$true] %s25_s13  ;;  %s48_s16 = int_to_ptr.hbm [resolvable:$true] %s47_s16 }
   0xb   :  { %28 = dma.hbm_to_vmem [thread:$0]  %s24_s10, 64, %s26_s13, [#allocation4]  }
   0xc   :  { %s57_s18 = sshll.u32 %s1361_s3, 4  ;;  %s1284_s19 = smov [#allocation8]   ;;  %s58_s18 = int_to_ptr.hbm [resolvable:$true] %s57_s18 }
   0xd   :  { %s49_s20 = sshll.u32 %s1284_s19, 4  ;;  %s1285_s0 = smov [#allocation9]   ;;  %s50_s20 = int_to_ptr.vmem [resolvable:$true] %s49_s20 }
   0xe   :  { %52 = dma.hbm_to_vmem [thread:$0]  %s48_s16, 64, %s50_s20, [#allocation7]  }
   0xf   :  { %s59_s21 = sshll.u32 %s1285_s0, 4  ;;  %s1286_s22 = smov 128   ;;  %s60_s21 = int_to_ptr.vmem [resolvable:$true] %s59_s21 }
  0x10   :  { %s1287_s23 = smov 8  }
  0x11   :  { %65 = dma.hbm_to_vmem [thread:$0]  %s58_s18, 8192, %s60_s21, [#allocation10], %s1286_s22, %s1286_s22, %s1287_s23  }
  0x12   :  { %1272 = dma.done.wait [#allocation4], 64  }
  0x13   :  { %1273 = vsyncadd [#allocation4], 4294967232 }
  0x14   :  { %1274 = dma.done.wait [#allocation7], 1088  }
  0x15   :  { %1275 = vsyncadd [#allocation7], 4294966208 }
  0x16   :  { %1276 = dma.done.wait [#allocation10], 8192  }
  0x17   :  { %1277 = vsyncadd [#allocation10], 4294959104  ;;  %vm148_vm0 = vcmask 261120   ;;  %v793_v1 = vld [vmem:[#allocation6 + $0x20] sm:$0xf]  ;;  %s763_s28 = sshll.u32 %s1365_s7, 4  ;;  %s764_s28 = int_to_ptr.hbm [resolvable:$true] %s763_s28 }
  0x18   :  { %v1073_v2 = vld [vmem:[#allocation6 + $0x2c] sm:$0xf0]  ;;  %v1071_v3 = vld [vmem:[#allocation6 + $0x24] sm:$0xf]  ;;  %v795_v5 = vld [vmem:[#allocation6 + $0x30] sm:$0xf0] }
  0x19   :  { %v794_v4 = vor.u32 %v1073_v2, %v793_v1  ;;  %v801_v6 = vld [vmem:[#allocation6 + $0x28] sm:$0xf]  ;;  %v1074_v7 = vld [vmem:[#allocation6 + $0x34] sm:$0xf0]  ;;  %v798_v8 = vor.u32 %v1071_v3, %v795_v5  ;;  %v1072_v10 = vld [vmem:[#allocation6 + $0x2c] sm:$0xf] }
  0x1a   :  { %v802_v9 = vor.u32 %v1074_v7, %v801_v6  ;;  %v803_v11 = vld [vmem:[#allocation6 + $0x38] sm:$0xf0]  ;;  %v777_v12 = vld [vmem:[#allocation6] sm:$0xf]  ;;  %v1069_v14 = vld [vmem:[#allocation6 + $0xc] sm:$0xf0] }
  0x1b   :  { %158 = vmatpush.bf16.msra.mxu0 %v794_v4  ;;  %v806_v13 = vor.u32 %v1072_v10, %v803_v11  ;;  %v1067_v15 = vld [vmem:[#allocation6 + $0x4] sm:$0xf]  ;;  %v779_v16 = vld [vmem:[#allocation6 + $0x10] sm:$0xf0]  ;;  %171 = vmatpush.bf16.msra.mxu1 %v798_v8  ;;  %v778_v17 = vor.u32 %v1069_v14, %v777_v12  ;;  %v785_v19 = vld [vmem:[#allocation6 + $0x8] sm:$0xf] }
  0x1c   :  { %184 = vmatpush.bf16.msra.mxu2 %v802_v9  ;;  %v782_v18 = vor.u32 %v1067_v15, %v779_v16  ;;  %v1070_v20 = vld [vmem:[#allocation6 + $0x14] sm:$0xf0]  ;;  %v1068_v21 = vld [vmem:[#allocation6 + $0xc] sm:$0xf]  ;;  %v787_v23 = vld [vmem:[#allocation6 + $0x18] sm:$0xf0] }
  0x1d   :  { %197 = vmatpush.bf16.msra.mxu3 %v806_v13  ;;  %v786_v22 = vor.u32 %v1070_v20, %v785_v19  ;;  %v89_v24 = vld [vmem:[#allocation3] sm:$0xf]  ;;  %v869_v25 = vld [vmem:[#allocation9 + $0x70] sm:$0xf]  ;;  %v790_v26 = vor.u32 %v1068_v21, %v787_v23  ;;  %v861_v32 = vld [vmem:[#allocation9 + $0x60] sm:$0xf] }
  0x1e   :  { %v1090_v27 = vld [vmem:[#allocation9 + $0x74] sm:$0xf0]  ;;  %v933_v28 = vld [vmem:[#allocation9 + $0xf0] sm:$0xf]  ;;  %v1088_v33 = vld [vmem:[#allocation9 + $0x64] sm:$0xf0] }
  0x1f   :  { %v1106_v29 = vld [vmem:[#allocation9 + $0xf4] sm:$0xf0]  ;;  %159 = vmatpush.bf16.msra.mxu0 %v778_v17  ;;  %v870_v30 = vor.u32 %v1090_v27, %v869_v25  ;;  %v925_v34 = vld [vmem:[#allocation9 + $0xe0] sm:$0xf]  ;;  %172 = vmatpush.bf16.msra.mxu1 %v782_v18  ;;  %v1104_v35 = vld [vmem:[#allocation9 + $0xe4] sm:$0xf0]  ;;  %v862_v38 = vor.u32 %v1088_v33, %v861_v32 }
  0x20   :  { %v934_v31 = vor.u32 %v1106_v29, %v933_v28  ;;  %185 = vmatpush.bf16.msra.mxu2 %v786_v22  ;;  %v997_v36 = vld [vmem:[#allocation9 + $0x170] sm:$0xf]  ;;  %v1122_v37 = vld [vmem:[#allocation9 + $0x174] sm:$0xf0]  ;;  %v926_v43 = vor.u32 %v1104_v35, %v925_v34  ;;  %v989_v48 = vld [vmem:[#allocation9 + $0x160] sm:$0xf] }
  0x21   :  { %198 = vmatpush.bf16.msra.mxu3 %v790_v26  ;;  %v998_v39 = vor.u32 %v1122_v37, %v997_v36  ;;  %v1061_v40 = vld [vmem:[#allocation9 + $0x1f0] sm:$0xf]  ;;  %v1138_v41 = vld [vmem:[#allocation9 + $0x1f4] sm:$0xf0]  ;;  %v1120_v49 = vld [vmem:[#allocation9 + $0x164] sm:$0xf0] }
  0x22   :  { %v853_v42 = vld [vmem:[#allocation9 + $0x50] sm:$0xf]  ;;  %807 = vmatmul.msk.bf16.vlgmr.msra.gmra.mxu0 %vm148_vm0, %v89_v24  ;;  %v1062_v44 = vor.u32 %v1138_v41, %v1061_v40  ;;  %v1086_v45 = vld [vmem:[#allocation9 + $0x54] sm:$0xf0]  ;;  %808 = vmatmul.msk.bf16.vlgmr.msra.gmra.mxu1 %vm148_vm0, %v89_v24  ;;  %v1053_v50 = vld [vmem:[#allocation9 + $0x1e0] sm:$0xf]  ;;  %v990_v51 = vor.u32 %v1120_v49, %v989_v48 }
  0x23   :  { %602 = vmatpush.bf16.msrb.mxu0 %v870_v30  ;;  %615 = vmatpush.bf16.msrb.mxu1 %v934_v31  ;;  %v917_v46 = vld [vmem:[#allocation9 + $0xd0] sm:$0xf]  ;;  %v1102_v47 = vld [vmem:[#allocation9 + $0xd4] sm:$0xf0]  ;;  %v1136_v52 = vld [vmem:[#allocation9 + $0x1e4] sm:$0xf0]  ;;  %v854_v53 = vor.u32 %v1086_v45, %v853_v42 }
  0x24   :  { %809 = vmatmul.msk.bf16.vlgmr.msra.gmra.mxu2 %vm148_vm0, %v89_v24  ;;  %810 = vmatmul.msk.bf16.vlgmr.msra.gmra.mxu3 %vm148_vm0, %v89_v24  ;;  %v1054_v54 = vor.u32 %v1136_v52, %v1053_v50  ;;  %v845_v55 = vld [vmem:[#allocation9 + $0x40] sm:$0xf]  ;;  %v1084_v56 = vld [vmem:[#allocation9 + $0x44] sm:$0xf0]  ;;  %v981_v57 = vld [vmem:[#allocation9 + $0x150] sm:$0xf]  ;;  %v918_v58 = vor.u32 %v1102_v47, %v917_v46 }
  0x25   :  { %628 = vmatpush.bf16.msrb.mxu2 %v998_v39  ;;  %641 = vmatpush.bf16.msrb.mxu3 %v1062_v44  ;;  %v1118_v59 = vld [vmem:[#allocation9 + $0x154] sm:$0xf0]  ;;  %v1045_v60 = vld [vmem:[#allocation9 + $0x1d0] sm:$0xf]  ;;  %v909_v62 = vld [vmem:[#allocation9 + $0xc0] sm:$0xf]  ;;  %v846_v1 = vor.u32 %v1084_v56, %v845_v55 }
  0x26   :  { %v1134_v61 = vld [vmem:[#allocation9 + $0x1d4] sm:$0xf0]  ;;  %v1100_v63 = vld [vmem:[#allocation9 + $0xc4] sm:$0xf0]  ;;  %v982_v0 = vor.u32 %v1118_v59, %v981_v57  ;;  %v837_v3 = vld [vmem:[#allocation9 + $0x30] sm:$0xf] }
  0x27   :  { %603 = vmatpush.bf16.msrb.mxu0 %v862_v38  ;;  %616 = vmatpush.bf16.msrb.mxu1 %v926_v43  ;;  %v1046_v2 = vor.u32 %v1134_v61, %v1045_v60  ;;  %v973_v4 = vld [vmem:[#allocation9 + $0x140] sm:$0xf]  ;;  %v1116_v5 = vld [vmem:[#allocation9 + $0x144] sm:$0xf0]  ;;  %v910_v6 = vor.u32 %v1100_v63, %v909_v62  ;;  %v1082_v7 = vld [vmem:[#allocation9 + $0x34] sm:$0xf0] }
  0x28   :  { %v1037_v8 = vld [vmem:[#allocation9 + $0x1c0] sm:$0xf]  ;;  %v1132_v9 = vld [vmem:[#allocation9 + $0x1c4] sm:$0xf0]  ;;  %v901_v10 = vld [vmem:[#allocation9 + $0xb0] sm:$0xf]  ;;  %v974_v12 = vor.u32 %v1116_v5, %v973_v4  ;;  %v838_v13 = vor.u32 %v1082_v7, %v837_v3 }
  0x29   :  { %629 = vmatpush.bf16.msrb.mxu2 %v990_v51  ;;  %642 = vmatpush.bf16.msrb.mxu3 %v1054_v54  ;;  %v1098_v11 = vld [vmem:[#allocation9 + $0xb4] sm:$0xf0]  ;;  %v1038_v14 = vor.u32 %v1132_v9, %v1037_v8  ;;  %v829_v15 = vld [vmem:[#allocation9 + $0x20] sm:$0xf]  ;;  %v965_v16 = vld [vmem:[#allocation9 + $0x130] sm:$0xf] }
  0x2a   :  { %v1114_v17 = vld [vmem:[#allocation9 + $0x134] sm:$0xf0]  ;;  %v902_v18 = vor.u32 %v1098_v11, %v901_v10  ;;  %v1080_v19 = vld [vmem:[#allocation9 + $0x24] sm:$0xf0]  ;;  %v1029_v20 = vld [vmem:[#allocation9 + $0x1b0] sm:$0xf] }
  0x2b   :  { %604 = vmatpush.bf16.msrb.mxu0 %v854_v53  ;;  %617 = vmatpush.bf16.msrb.mxu1 %v918_v58  ;;  %v1130_v21 = vld [vmem:[#allocation9 + $0x1b4] sm:$0xf0]  ;;  %v893_v22 = vld [vmem:[#allocation9 + $0xa0] sm:$0xf]  ;;  %v1096_v23 = vld [vmem:[#allocation9 + $0xa4] sm:$0xf0]  ;;  %v966_v24 = vor.u32 %v1114_v17, %v965_v16  ;;  %v830_v25 = vor.u32 %v1080_v19, %v829_v15 }
  0x2c   :  { %v1030_v26 = vor.u32 %v1130_v21, %v1029_v20  ;;  %v821_v27 = vld [vmem:[#allocation9 + $0x10] sm:$0xf]  ;;  %v957_v28 = vld [vmem:[#allocation9 + $0x120] sm:$0xf]  ;;  %v1112_v29 = vld [vmem:[#allocation9 + $0x124] sm:$0xf0]  ;;  %v894_v30 = vor.u32 %v1096_v23, %v893_v22 }
  0x2d   :  { %630 = vmatpush.bf16.msrb.mxu2 %v982_v0  ;;  %643 = vmatpush.bf16.msrb.mxu3 %v1046_v2  ;;  %v1078_v31 = vld [vmem:[#allocation9 + $0x14] sm:$0xf0]  ;;  %v1021_v32 = vld [vmem:[#allocation9 + $0x1a0] sm:$0xf]  ;;  %v1128_v33 = vld [vmem:[#allocation9 + $0x1a4] sm:$0xf0]  ;;  %v958_v36 = vor.u32 %v1112_v29, %v957_v28 }
  0x2e   :  { %v885_v34 = vld [vmem:[#allocation9 + $0x90] sm:$0xf]  ;;  %v1094_v35 = vld [vmem:[#allocation9 + $0x94] sm:$0xf0]  ;;  %v813_v37 = vld [vmem:[#allocation9] sm:$0xf]  ;;  %v822_v38 = vor.u32 %v1078_v31, %v821_v27  ;;  %v1022_v39 = vor.u32 %v1128_v33, %v1021_v32 }
  0x2f   :  { %605 = vmatpush.bf16.msrb.mxu0 %v846_v1  ;;  %618 = vmatpush.bf16.msrb.mxu1 %v910_v6  ;;  %v1076_v40 = vld [vmem:[#allocation9 + $0x4] sm:$0xf0]  ;;  %v949_v41 = vld [vmem:[#allocation9 + $0x110] sm:$0xf]  ;;  %v1110_v42 = vld [vmem:[#allocation9 + $0x114] sm:$0xf0]  ;;  %v886_v43 = vor.u32 %v1094_v35, %v885_v34 }
  0x30   :  { %v877_v44 = vld [vmem:[#allocation9 + $0x80] sm:$0xf]  ;;  %v1013_v45 = vld [vmem:[#allocation9 + $0x190] sm:$0xf]  ;;  %v1126_v46 = vld [vmem:[#allocation9 + $0x194] sm:$0xf0]  ;;  %v950_v52 = vor.u32 %v1110_v42, %v949_v41  ;;  %v814_v53 = vor.u32 %v1076_v40, %v813_v37 }
  0x31   :  { %631 = vmatpush.bf16.msrb.mxu2 %v974_v12  ;;  %644 = vmatpush.bf16.msrb.mxu3 %v1038_v14  ;;  %v1092_v47 = vld [vmem:[#allocation9 + $0x84] sm:$0xf0]  ;;  %v1089_v48 = vld [vmem:[#allocation9 + $0x74] sm:$0xf]  ;;  %v871_v49 = vld [vmem:[#allocation9 + $0x78] sm:$0xf0]  ;;  %v1014_v54 = vor.u32 %v1126_v46, %v1013_v45 }
  0x32   :  { %v1105_v50 = vld [vmem:[#allocation9 + $0xf4] sm:$0xf]  ;;  %v935_v51 = vld [vmem:[#allocation9 + $0xf8] sm:$0xf0]  ;;  %v1087_v55 = vld [vmem:[#allocation9 + $0x64] sm:$0xf]  ;;  %v878_v59 = vor.u32 %v1092_v47, %v877_v44  ;;  %v874_v60 = vor.u32 %v1089_v48, %v871_v49 }
  0x33   :  { %606 = vmatpush.bf16.msrb.mxu0 %v838_v13  ;;  %619 = vmatpush.bf16.msrb.mxu1 %v902_v18  ;;  %v941_v56 = vld [vmem:[#allocation9 + $0x100] sm:$0xf]  ;;  %v1108_v57 = vld [vmem:[#allocation9 + $0x104] sm:$0xf0]  ;;  %v1121_v62 = vld [vmem:[#allocation9 + $0x174] sm:$0xf]  ;;  %v938_v0 = vor.u32 %v1105_v50, %v935_v51 }
  0x34   :  { %v1005_v58 = vld [vmem:[#allocation9 + $0x180] sm:$0xf]  ;;  %v1124_v61 = vld [vmem:[#allocation9 + $0x184] sm:$0xf0]  ;;  %v999_v63 = vld [vmem:[#allocation9 + $0x178] sm:$0xf0]  ;;  %v942_v6 = vor.u32 %v1108_v57, %v941_v56 }
  0x35   :  { %632 = vmatpush.bf16.msrb.mxu2 %v966_v24  ;;  %645 = vmatpush.bf16.msrb.mxu3 %v1030_v26  ;;  %v863_v1 = vld [vmem:[#allocation9 + $0x68] sm:$0xf0]  ;;  %v1137_v2 = vld [vmem:[#allocation9 + $0x1f4] sm:$0xf]  ;;  %v1063_v3 = vld [vmem:[#allocation9 + $0x1f8] sm:$0xf0]  ;;  %v1006_v7 = vor.u32 %v1124_v61, %v1005_v58  ;;  %v1002_v8 = vor.u32 %v1121_v62, %v999_v63 }
  0x36   :  { %v1103_v4 = vld [vmem:[#allocation9 + $0xe4] sm:$0xf]  ;;  %v927_v5 = vld [vmem:[#allocation9 + $0xe8] sm:$0xf0]  ;;  %v866_v9 = vor.u32 %v1087_v55, %v863_v1  ;;  %v1066_v10 = vor.u32 %v1137_v2, %v1063_v3  ;;  %v1085_v12 = vld [vmem:[#allocation9 + $0x54] sm:$0xf] }
  0x37   :  { %607 = vmatpush.bf16.msrb.mxu0 %v830_v25  ;;  %620 = vmatpush.bf16.msrb.mxu1 %v894_v30  ;;  %v930_v11 = vor.u32 %v1103_v4, %v927_v5  ;;  %v855_v13 = vld [vmem:[#allocation9 + $0x58] sm:$0xf0]  ;;  %v1101_v14 = vld [vmem:[#allocation9 + $0xd4] sm:$0xf]  ;;  %v1119_v18 = vld [vmem:[#allocation9 + $0x164] sm:$0xf] }
  0x38   :  { %v858_v15 = vor.u32 %v1085_v12, %v855_v13  ;;  %v919_v16 = vld [vmem:[#allocation9 + $0xd8] sm:$0xf0]  ;;  %v991_v19 = vld [vmem:[#allocation9 + $0x168] sm:$0xf0]  ;;  %v1135_v21 = vld [vmem:[#allocation9 + $0x1e4] sm:$0xf] }
  0x39   :  { %633 = vmatpush.bf16.msrb.mxu2 %v958_v36  ;;  %646 = vmatpush.bf16.msrb.mxu3 %v1022_v39  ;;  %v922_v17 = vor.u32 %v1101_v14, %v919_v16  ;;  %v994_v20 = vor.u32 %v1119_v18, %v991_v19  ;;  %v1055_v22 = vld [vmem:[#allocation9 + $0x1e8] sm:$0xf0]  ;;  %v1083_v24 = vld [vmem:[#allocation9 + $0x44] sm:$0xf]  ;;  %v1117_v30 = vld [vmem:[#allocation9 + $0x154] sm:$0xf] }
  0x3a   :  { %v1058_v23 = vor.u32 %v1135_v21, %v1055_v22  ;;  %v847_v25 = vld [vmem:[#allocation9 + $0x48] sm:$0xf0]  ;;  %v1099_v26 = vld [vmem:[#allocation9 + $0xc4] sm:$0xf]  ;;  %v983_v31 = vld [vmem:[#allocation9 + $0x158] sm:$0xf0] }
  0x3b   :  { %608 = vmatpush.bf16.msrb.mxu0 %v822_v38  ;;  %621 = vmatpush.bf16.msrb.mxu1 %v886_v43  ;;  %v850_v27 = vor.u32 %v1083_v24, %v847_v25  ;;  %v911_v28 = vld [vmem:[#allocation9 + $0xc8] sm:$0xf0]  ;;  %v1133_v32 = vld [vmem:[#allocation9 + $0x1d4] sm:$0xf]  ;;  %v986_v33 = vor.u32 %v1117_v30, %v983_v31  ;;  %v1047_v34 = vld [vmem:[#allocation9 + $0x1d8] sm:$0xf0] }
  0x3c   :  { %v914_v29 = vor.u32 %v1099_v26, %v911_v28  ;;  %v1050_v35 = vor.u32 %v1133_v32, %v1047_v34  ;;  %v1081_v36 = vld [vmem:[#allocation9 + $0x34] sm:$0xf]  ;;  %v839_v37 = vld [vmem:[#allocation9 + $0x38] sm:$0xf0]  ;;  %v1115_v42 = vld [vmem:[#allocation9 + $0x144] sm:$0xf] }
  0x3d   :  { %634 = vmatpush.bf16.msrb.mxu2 %v950_v52  ;;  %647 = vmatpush.bf16.msrb.mxu3 %v1014_v54  ;;  %v842_v38 = vor.u32 %v1081_v36, %v839_v37  ;;  %v1097_v39 = vld [vmem:[#allocation9 + $0xb4] sm:$0xf]  ;;  %v903_v40 = vld [vmem:[#allocation9 + $0xb8] sm:$0xf0]  ;;  %v975_v43 = vld [vmem:[#allocation9 + $0x148] sm:$0xf0] }
  0x3e   :  { %v906_v41 = vor.u32 %v1097_v39, %v903_v40  ;;  %v1131_v44 = vld [vmem:[#allocation9 + $0x1c4] sm:$0xf]  ;;  %v978_v45 = vor.u32 %v1115_v42, %v975_v43  ;;  %v1039_v46 = vld [vmem:[#allocation9 + $0x1c8] sm:$0xf0]  ;;  %v1113_v54 = vld [vmem:[#allocation9 + $0x134] sm:$0xf] }
  0x3f   :  { %609 = vmatpush.bf16.msrb.mxu0 %v814_v53  ;;  %622 = vmatpush.bf16.msrb.mxu1 %v878_v59  ;;  %v1042_v47 = vor.u32 %v1131_v44, %v1039_v46  ;;  %v1079_v48 = vld [vmem:[#allocation9 + $0x24] sm:$0xf]  ;;  %v831_v49 = vld [vmem:[#allocation9 + $0x28] sm:$0xf0]  ;;  %v967_v55 = vld [vmem:[#allocation9 + $0x138] sm:$0xf0] }
  0x40   :  { %v1095_v50 = vld [vmem:[#allocation9 + $0xa4] sm:$0xf]  ;;  %v834_v51 = vor.u32 %v1079_v48, %v831_v49  ;;  %v895_v52 = vld [vmem:[#allocation9 + $0xa8] sm:$0xf0]  ;;  %v1129_v56 = vld [vmem:[#allocation9 + $0x1b4] sm:$0xf]  ;;  %v970_v57 = vor.u32 %v1113_v54, %v967_v55 }
  0x41   :  { %635 = vmatpush.bf16.msrb.mxu2 %v942_v6  ;;  %648 = vmatpush.bf16.msrb.mxu3 %v1006_v7  ;;  %v898_v53 = vor.u32 %v1095_v50, %v895_v52  ;;  %v1031_v58 = vld [vmem:[#allocation9 + $0x1b8] sm:$0xf0]  ;;  %v1093_v62 = vld [vmem:[#allocation9 + $0x94] sm:$0xf]  ;;  %v1111_v1 = vld [vmem:[#allocation9 + $0x124] sm:$0xf] }
  0x42   :  { %v1034_v59 = vor.u32 %v1129_v56, %v1031_v58  ;;  %v823_v61 = vld [vmem:[#allocation9 + $0x18] sm:$0xf0]  ;;  %v959_v2 = vld [vmem:[#allocation9 + $0x128] sm:$0xf0]  ;;  %v1127_v5 = vld [vmem:[#allocation9 + $0x1a4] sm:$0xf] }
  0x43   :  { %654 = vmatpush.bf16.msra.mxu0 %v874_v60  ;;  %667 = vmatpush.bf16.msra.mxu1 %v938_v0  ;;  %v1077_v60 = vld [vmem:[#allocation9 + $0x14] sm:$0xf]  ;;  %v887_v0 = vld [vmem:[#allocation9 + $0x98] sm:$0xf0]  ;;  %v962_v4 = vor.u32 %v1111_v1, %v959_v2  ;;  %v1023_v6 = vld [vmem:[#allocation9 + $0x1a8] sm:$0xf0] }
  0x44   :  { %v826_v63 = vor.u32 %v1077_v60, %v823_v61  ;;  %v890_v3 = vor.u32 %v1093_v62, %v887_v0  ;;  %v1075_v7 = vld [vmem:[#allocation9 + $0x4] sm:$0xf]  ;;  %v1109_v14 = vld [vmem:[#allocation9 + $0x114] sm:$0xf]  ;;  %v1015_v18 = vld [vmem:[#allocation9 + $0x198] sm:$0xf0] }
  0x45   :  { %680 = vmatpush.bf16.msra.mxu2 %v1002_v8  ;;  %693 = vmatpush.bf16.msra.mxu3 %v1066_v10  ;;  %v1026_v8 = vor.u32 %v1127_v5, %v1023_v6  ;;  %v1091_v10 = vld [vmem:[#allocation9 + $0x84] sm:$0xf]  ;;  %v1125_v16 = vld [vmem:[#allocation9 + $0x194] sm:$0xf]  ;;  %v943_v21 = vld [vmem:[#allocation9 + $0x108] sm:$0xf0] }
  0x46   :  { %v1018_v19 = vor.u32 %v1125_v16, %v1015_v18  ;;  %v1123_v22 = vld [vmem:[#allocation9 + $0x184] sm:$0xf]  ;;  %v1007_v24 = vld [vmem:[#allocation9 + $0x188] sm:$0xf0]  ;;  %v98_v25 = vld [vmem:[#allocation8] sm:$0xf] }
  0x47   :  { %655 = vmatpush.bf16.msra.mxu0 %v866_v9  ;;  %668 = vmatpush.bf16.msra.mxu1 %v930_v11  ;;  %v815_v9 = vld [vmem:[#allocation9 + $0x8] sm:$0xf0]  ;;  %v1010_v26 = vor.u32 %v1123_v22, %v1007_v24  ;;  %v101_v28 = vperm.slane %v98_v25, 1  ;;  %v103_v37 = vperm.slane %v98_v25, 3  ;;  %v711_v61 = vld [vmem:[#allocation2] sm:$0x1] }
  0x48   :  { %v879_v11 = vld [vmem:[#allocation9 + $0x88] sm:$0xf0]  ;;  %v818_v12 = vor.u32 %v1075_v7, %v815_v9  ;;  %v1288_v0 = vmov 0   ;;  %vm754_vm1 = vcmask 57344  }
  0x49   :  { %681 = vmatpush.bf16.msra.mxu2 %v994_v20  ;;  %694 = vmatpush.bf16.msra.mxu3 %v1058_v23  ;;  %v882_v13 = vor.u32 %v1091_v10, %v879_v11  ;;  %v1107_v20 = vld [vmem:[#allocation9 + $0x104] sm:$0xf]  ;;  %v276_v52 = vld [vmem:[%s1362_s4] sm:$0x3]  ;;  %s1289_s4 = smov [#allocation11]  }
  0x4a   :  { %v946_v23 = vor.u32 %v1107_v20, %v943_v21  ;;  %v278_v55 = vperm.slane %v276_v52, 0  ;;  %1149 = vset.pattern.permute.xlu0 %v1288_v0  ;;  %v279_v6 = vperm.slane %v276_v52, 1 }
  0x4b   :  { %656 = vmatpush.bf16.msra.mxu0 %v858_v15  ;;  %669 = vmatpush.bf16.msra.mxu1 %v922_v17  ;;  %v951_v15 = vld [vmem:[#allocation9 + $0x118] sm:$0xf0] }
  0x4c   :  { %v954_v17 = vor.u32 %v1109_v14, %v951_v15  ;;  %714 = vperm.xlu0 %1149, %v711_v61  }
  0x4d   :  { %682 = vmatpush.bf16.msra.mxu2 %v986_v33  ;;  %695 = vmatpush.bf16.msra.mxu3 %v1050_v35  ;;  %v102_v35 = vperm.slane %v98_v25, 2 }
  0x4f   :  { %657 = vmatpush.bf16.msra.mxu0 %v850_v27  ;;  %670 = vmatpush.bf16.msra.mxu1 %v914_v29  ;;  %v100_v27 = vperm.slane %v98_v25, 0 }
  0x51   :  { %683 = vmatpush.bf16.msra.mxu2 %v978_v45  ;;  %696 = vmatpush.bf16.msra.mxu3 %v1042_v47 }
  0x53   :  { %658 = vmatpush.bf16.msra.mxu0 %v842_v38  ;;  %671 = vmatpush.bf16.msra.mxu1 %v906_v41 }
  0x55   :  { %684 = vmatpush.bf16.msra.mxu2 %v970_v57  ;;  %697 = vmatpush.bf16.msra.mxu3 %v1034_v59 }
  0x57   :  { %659 = vmatpush.bf16.msra.mxu0 %v834_v51  ;;  %672 = vmatpush.bf16.msra.mxu1 %v898_v53  ;;  %v708_v51 = vld [vmem:[%s1363_s5] sm:$0x3]  ;;  %s761_s5 = sshll.u32 %s1289_s4, 4  ;;  %s762_s5 = int_to_ptr.vmem [resolvable:$true] %s761_s5 }
  0x58   :  { %719 = vst [vmem:[#allocation1] ss:$9 sm:$0xff] %v708_v51 }
  0x59   :  { %685 = vmatpush.bf16.msra.mxu2 %v962_v4  ;;  %698 = vmatpush.bf16.msra.mxu3 %v1026_v8 }
  0x5b   :  { %660 = vmatpush.bf16.msra.mxu0 %v826_v63  ;;  %673 = vmatpush.bf16.msra.mxu1 %v890_v3 }
  0x5d   :  { %686 = vmatpush.bf16.msra.mxu2 %v954_v17  ;;  %699 = vmatpush.bf16.msra.mxu3 %v1018_v19 }
  0x5f   :  { %661 = vmatpush.bf16.msra.mxu0 %v818_v12  ;;  %674 = vmatpush.bf16.msra.mxu1 %v882_v13  ;;  %v720_v12 = vld [vmem:[#allocation1] sm:$0xff]  ;;  %v721_v22 = vld [vmem:[#allocation1 + $0x9] sm:$0xff] }
  0x61   :  { %687 = vmatpush.bf16.msra.mxu2 %v946_v23  ;;  %700 = vmatpush.bf16.msra.mxu3 %v1010_v26 }
  0x9f   :  { %v161_v29 = vpop.f32.mrf.mxu0  ;;  %v174_v31 = vpop.f32.mrf.mxu1 }
  0xa0   :  { %v162_v30 = vadd.f32 %v161_v29, %v100_v27  ;;  %v175_v32 = vadd.f32 %v174_v31, %v101_v28 }
  0xa2   :  { %v204_v33 = vmax.f32 %v162_v30, 0.0  ;;  %v205_v34 = vmax.f32 %v175_v32, 0.0 }
  0xa4   :  { %v208_v36 = vpack.c.bf16 %v204_v33, %v204_v33  ;;  %v209_v38 = vpack.c.bf16 %v205_v34, %v205_v34 }
  0xa6   :  { %610 = vmatmul.bf16.vlgmr.msrb.gmra.mxu0 %v208_v36  ;;  %623 = vmatmul.bf16.vlgmr.msrb.gmra.mxu1 %v209_v38 }
  0xa7   :  { %v187_v39 = vpop.f32.mrf.mxu2  ;;  %v200_v41 = vpop.f32.mrf.mxu3 }
  0xa8   :  { %v188_v40 = vadd.f32 %v187_v39, %v102_v35  ;;  %v163_v42 = vpop.f32.mrf.mxu0  ;;  %v201_v43 = vadd.f32 %v200_v41, %v103_v37  ;;  %v176_v44 = vpop.f32.mrf.mxu1 }
  0xaa   :  { %v206_v45 = vmax.f32 %v188_v40, 0.0  ;;  %v207_v46 = vmax.f32 %v201_v43, 0.0 }
  0xac   :  { %v210_v47 = vpack.c.bf16 %v206_v45, %v206_v45  ;;  %v211_v48 = vpack.c.bf16 %v207_v46, %v207_v46 }
  0xae   :  { %636 = vmatmul.bf16.vlgmr.msrb.gmra.mxu2 %v210_v47  ;;  %649 = vmatmul.bf16.vlgmr.msrb.gmra.mxu3 %v211_v48 }
  0xaf   :  { %v189_v49 = vpop.f32.mrf.mxu2  ;;  %v202_v50 = vpop.f32.mrf.mxu3 }
  0xb6   :  { %662 = vmatmul.bf16.vlgmr.msra.gmra.mxu0 %v208_v36  ;;  %675 = vmatmul.bf16.vlgmr.msra.gmra.mxu1 %v209_v38 }
  0xbe   :  { %688 = vmatmul.bf16.vlgmr.msra.gmra.mxu2 %v210_v47  ;;  %701 = vmatmul.bf16.vlgmr.msra.gmra.mxu3 %v211_v48  ;;  %v715_v24 = vpop.permute.xlu0 %714 }
  0xbf   :  { %v717_v26 = vperm.slane %v715_v24, 0 }
 0x123   :  { %v611_v53 = vpop.f32.mrf.mxu0  ;;  %v624_v54 = vpop.f32.mrf.mxu1 }
 0x124   :  { %v612_v56 = vadd.f32 %v611_v53, %v278_v55 }
 0x126   :  { %v625_v59 = vadd.f32 %v624_v54, %v612_v56 }
 0x12b   :  { %v613_v57 = vpop.f32.mrf.mxu0  ;;  %v626_v58 = vpop.f32.mrf.mxu1 }
 0x131   :  { %v637_v60 = vpop.f32.mrf.mxu2  ;;  %v650_v63 = vpop.f32.mrf.mxu3 }
 0x132   :  { %v638_v62 = vadd.f32 %v637_v60, %v625_v59 }
 0x133   :  { %v663_v2 = vpop.f32.mrf.mxu0  ;;  %v676_v3 = vpop.f32.mrf.mxu1 }
 0x134   :  { %v651_v1 = vadd.f32 %v650_v63, %v638_v62  ;;  %v664_v9 = vadd.f32 %v663_v2, %v279_v6 }
 0x136   :  { %v706_v4 = vmax.f32 %v651_v1, 0.0  ;;  %v677_v13 = vadd.f32 %v676_v3, %v664_v9 }
 0x138   :  { %v709_v5 = vpack.c.bf16 %v706_v4, %v706_v4 }
 0x139   :  { %v639_v7 = vpop.f32.mrf.mxu2  ;;  %v652_v8 = vpop.f32.mrf.mxu3 }
 0x13a   :  { %731 = vmatpush.bf16.xpose.msrb.mxu0 %v709_v5 }
 0x13b   :  { %v665_v10 = vpop.f32.mrf.mxu0  ;;  %v678_v11 = vpop.f32.mrf.mxu1 }
 0x141   :  { %v689_v14 = vpop.f32.mrf.mxu2  ;;  %732 = vmatmul.bf16.vlgmr.msrb.gmra.mxu0 %v720_v12  ;;  %v702_v16 = vpop.f32.mrf.mxu3 }
 0x142   :  { %v690_v15 = vadd.f32 %v689_v14, %v677_v13 }
 0x144   :  { %v703_v17 = vadd.f32 %v702_v16, %v690_v15 }
 0x146   :  { %v707_v18 = vmax.f32 %v703_v17, 0.0 }
 0x148   :  { %v710_v19 = vpack.c.bf16 %v707_v18, %v707_v18 }
 0x149   :  { %v691_v20 = vpop.f32.mrf.mxu2  ;;  %v704_v21 = vpop.f32.mrf.mxu3 }
 0x14a   :  { %744 = vmatpush.bf16.xpose.msrb.mxu1 %v710_v19 }
 0x151   :  { %745 = vmatmul.bf16.vlgmr.msrb.gmra.mxu1 %v721_v22 }
 0x1be   :  { %v733_v23 = vpop.f32.mrf.mxu0 }
 0x1bf   :  { %v734_v27 = vadd.f32 %v733_v23, %v717_v26 }
 0x1c6   :  { %v735_v25 = vpop.f32.mrf.mxu0 }
 0x1ce   :  { %v746_v28 = vpop.f32.mrf.mxu1 }
 0x1cf   :  { %v747_v29 = vadd.f32 %v746_v28, %v734_v27 }
 0x1d1   :  { %v750_v30 = vmul.f32 0.5, %v747_v29 }
 0x1d3   :  { %1150 = vtanh.f32 %v750_v30 }
 0x1d6   :  { %v748_v31 = vpop.f32.mrf.mxu1 }
 0x1d9   :  { %v1151_v32 = vpop.eup %1150 }
 0x1da   :  { %v752_v33 = vadd.f32 1.0, %v1151_v32 }
 0x1dc   :  { %v753_v34 = vmul.f32 0.5, %v752_v33 }
 0x1de   :  { %755 = vst.msk [vmem:[#allocation11] sm:$0x1] %vm754_vm1, %v753_v34 }
 0x1df   :  { %766 = dma.vmem_to_hbm [thread:$0]  %s762_s5, 16, %s764_s28, [#allocation5]  }
 0x1e0   :  { %1278 = dma.done.wait [#allocation5], 16  }
 0x1e1   :  { %1279 = vsyncadd [#allocation5], 4294967280 }
 0x1e2   :  { %771 = vsyncpa [#allocation4], 1 }
 0x1e3   :  { %772 = vsyncpa [#allocation7], 1 }
 0x1e4   :  { %773 = vsyncpa [#allocation10], 1 }
 0x1e5   :  { %774 = vsyncpa [#allocation5], 1 }

</bundles_post_ra>
